<compile_context>
chip_gen: v7x
topology: tpu7x:2x2x1
jax: 0.10.0
libtpu: 0.0.40
codegen_flags: <defaults>
</compile_context>

<pallas_src>
import jax
import jax.numpy as jnp
from jax.experimental import pallas as pl
from jax.experimental.pallas import tpu as pltpu


def critic_kernel(x_ref, w1_ref, b1_ref, w2_ref, b2_ref, w3_ref, b3_ref, out_ref):
    # x streamed per batch tile in f32; bf16 cast for the MXU happens here
    # (cheap VPU op hidden under grid-step overhead).
    x = x_ref[...].astype(jnp.bfloat16)

    # Layer 1: (TB, S) @ (S, 128) -> f32 acc, + bias, ReLU
    h1 = jnp.dot(x, w1_ref[...], preferred_element_type=jnp.float32) + b1_ref[...]
    h1 = jnp.maximum(h1, 0.0).astype(jnp.bfloat16)

    # Layer 2: (TB, 128) @ (128, 256) -> f32 acc, + bias, ReLU
    h2 = jnp.dot(h1, w2_ref[...], preferred_element_type=jnp.float32) + b2_ref[...]
    h2 = jnp.maximum(h2, 0.0).astype(jnp.bfloat16)

    # Layer 3: (TB, 256) @ (256, 1) -> (TB, 1).  w3 is pre-transposed to a
    # column in the wrapper, so no per-step h2 transpose / M=1 matmul is
    # emitted; the (TB, 1) masked store is only TB*4 bytes per step.
    out = jnp.dot(h2, w3_ref[...], preferred_element_type=jnp.float32)
    out_ref[...] = (out + b3_ref[0]).astype(out_ref.dtype)


def _choose_tile_b(batch):
    """Batch tile selection.

    Big tiles amortize the fixed grid-step overhead and the per-step MXU
    weight pushes; for large batches we keep >= 2 grid steps so the v7x
    megacore 'parallel' dimension has work to shard (no effect on v5e/v6e).
    """
    target = 1024                                   # 512-2048 sweep sweet spot
    if batch <= 512:
        return max(8, ((batch + 7) // 8) * 8)       # single small tile
    return max(256, min(target, (batch // 2 // 256) * 256))


@jax.jit
def critic_forward(x, params):
    (w1, b1), (w2, b2), (w3, b3) = params
    B, S = x.shape

    tile_b = _choose_tile_b(B)
    n_tiles = pl.cdiv(B, tile_b)
    B_pad = n_tiles * tile_b

    # Pass f32 x straight through; pad only when needed (padded rows produce
    # bias-only outputs and are sliced off below).
    x_in = x if B_pad == B else jnp.pad(x, ((0, B_pad - B), (0, 0)))

    # Weights are tiny; a one-time bf16 cast in the wrapper is negligible.
    w1_b = w1.astype(jnp.bfloat16)
    w2_b = w2.astype(jnp.bfloat16)
    w3_b = w3.astype(jnp.bfloat16)

    out = pl.pallas_call(
        critic_kernel,
        out_shape=jax.ShapeDtypeStruct((B_pad, 1), jnp.float32),
        grid=(n_tiles,),
        in_specs=[
            pl.BlockSpec((tile_b, S), lambda i: (i, 0)),         # x: streamed
            pl.BlockSpec((S, 128), lambda i: (0, 0)),            # w1: resident
            pl.BlockSpec((1, 128), lambda i: (0, 0)),            # b1
            pl.BlockSpec((128, 256), lambda i: (0, 0)),          # w2
            pl.BlockSpec((1, 256), lambda i: (0, 0)),            # b2
            pl.BlockSpec((256, 1), lambda i: (0, 0)),            # w3 (in, 1)
            pl.BlockSpec(memory_space=pltpu.MemorySpace.SMEM),   # b3 scalar
        ],
        out_specs=pl.BlockSpec((tile_b, 1), lambda i: (i, 0)),
        compiler_params=pltpu.CompilerParams(
            dimension_semantics=("parallel",),                   # megacore on v7x
        ),
    )(x_in, w1_b, b1, w2_b, b2, w3_b, b3)

    return out[:B]


def init_params(key, state_size):
    # Deterministic synthetic init (PyTorch-Linear-like uniform fan-in scaling),
    # stored in (in, out) layout so the kernel computes x @ W + b.
    def linear(key, fan_in, fan_out):
        k_w, k_b = jax.random.split(key)
        bound = 1.0 / jnp.sqrt(fan_in)
        w = jax.random.uniform(k_w, (fan_in, fan_out), jnp.float32, -bound, bound)
        b = jax.random.uniform(k_b, (1, fan_out), jnp.float32, -bound, bound)
        return w, b

    k1, k2, k3 = jax.random.split(key, 3)
    w1, b1 = linear(k1, state_size, 128)
    w2, b2 = linear(k2, 128, 256)
    w3, b3 = linear(k3, 256, 1)
    return (w1, b1), (w2, b2), (w3, b3.reshape(1))   # b3 as (1,) for SMEM


def critic_ref(x, params):
    # Plain-JAX reference mirroring the kernel's bf16 rounding points but
    # accumulating in f32 (keeps the tolerance tight).
    (w1, b1), (w2, b2), (w3, b3) = params
    r = lambda a: a.astype(jnp.bfloat16).astype(jnp.float32)
    h1 = jnp.maximum(r(x) @ r(w1) + b1, 0.0)
    h2 = jnp.maximum(r(h1) @ r(w2) + b2, 0.0)
    return r(h2) @ r(w3) + b3


if __name__ == "__main__":
    key = jax.random.PRNGKey(0)
    k_params, k_x = jax.random.split(key)

    batch, state_size = 8, 32
    params = init_params(k_params, state_size)
    x = jax.random.normal(k_x, (batch, state_size), jnp.float32)

    out = critic_forward(x, params)
    out = jax.block_until_ready(out)

    ref = critic_ref(x, params)
    assert out.shape == (batch, 1)
    assert jnp.allclose(out, ref, atol=2e-2, rtol=2e-2), "mismatch vs reference"

    print("KERNEL_OK")
</pallas_src>

<mosaic_0001>
module attributes {stable_mosaic.version = 11 : i64} {
  func.func @critic_kernel(%arg0: i32, %arg1: memref<8x32xf32, #tpu.memory_space<vmem>>, %arg2: memref<32x128xbf16, #tpu.memory_space<vmem>>, %arg3: memref<1x128xf32, #tpu.memory_space<vmem>>, %arg4: memref<128x256xbf16, #tpu.memory_space<vmem>>, %arg5: memref<1x256xf32, #tpu.memory_space<vmem>>, %arg6: memref<256x1xbf16, #tpu.memory_space<vmem>>, %arg7: memref<1xf32, #tpu.memory_space<smem>>, %arg8: memref<8x1xf32, #tpu.memory_space<vmem>>) attributes {dimension_semantics = [#tpu.dimension_semantics<parallel>], iteration_bounds = array<i64: 1>, scalar_prefetch = 0 : i64, scratch_operands = 0 : i64, tpu.core_type = #tpu.core_type<tc>, window_params = [{transform_indices = @transform_0, window_bounds = array<i64: 8, 32>}, {pipeline_mode = #tpu.pipeline_mode<synchronous>, transform_indices = @transform_1, window_bounds = array<i64: 32, 128>}, {pipeline_mode = #tpu.pipeline_mode<synchronous>, transform_indices = @transform_2, window_bounds = array<i64: 1, 128>}, {pipeline_mode = #tpu.pipeline_mode<synchronous>, transform_indices = @transform_3, window_bounds = array<i64: 128, 256>}, {pipeline_mode = #tpu.pipeline_mode<synchronous>, transform_indices = @transform_4, window_bounds = array<i64: 1, 256>}, {pipeline_mode = #tpu.pipeline_mode<synchronous>, transform_indices = @transform_5, window_bounds = array<i64: 256, 1>}, {transform_indices = @transform_6, window_bounds = array<i64: 1>}, {transform_indices = @transform_7, window_bounds = array<i64: 8, 1>}]} {
    %c0 = arith.constant 0 : index
    %c0_0 = arith.constant 0 : index
    %0 = vector.load %arg1[%c0, %c0_0] : memref<8x32xf32, #tpu.memory_space<vmem>>, vector<8x32xf32>
    %1 = arith.truncf %0 : vector<8x32xf32> to vector<8x32xbf16>
    %c0_1 = arith.constant 0 : index
    %c0_2 = arith.constant 0 : index
    %2 = vector.load %arg2[%c0_1, %c0_2] : memref<32x128xbf16, #tpu.memory_space<vmem>>, vector<32x128xbf16>
    %cst = arith.constant dense<0.000000e+00> : vector<8x128xf32>
    %3 = tpu.matmul %1, %2, %cst {dimension_numbers = #tpu.dot_dimension_numbers<[1], [0], [0], [1], [0, 0, 1, 1], [], []>} : vector<8x32xbf16>, vector<32x128xbf16>, vector<8x128xf32> -> vector<8x128xf32>
    %c0_3 = arith.constant 0 : index
    %c0_4 = arith.constant 0 : index
    %4 = vector.load %arg3[%c0_3, %c0_4] : memref<1x128xf32, #tpu.memory_space<vmem>>, vector<1x128xf32>
    %5 = vector.broadcast %4 : vector<1x128xf32> to vector<8x128xf32>
    %6 = arith.addf %3, %5 : vector<8x128xf32>
    %cst_5 = arith.constant 0.000000e+00 : f32
    %7 = vector.broadcast %cst_5 : f32 to vector<8x128xf32>
    %8 = arith.maximumf %6, %7 : vector<8x128xf32>
    %9 = arith.truncf %8 : vector<8x128xf32> to vector<8x128xbf16>
    %c0_6 = arith.constant 0 : index
    %c0_7 = arith.constant 0 : index
    %10 = vector.load %arg4[%c0_6, %c0_7] : memref<128x256xbf16, #tpu.memory_space<vmem>>, vector<128x256xbf16>
    %cst_8 = arith.constant dense<0.000000e+00> : vector<8x256xf32>
    %11 = tpu.matmul %9, %10, %cst_8 {dimension_numbers = #tpu.dot_dimension_numbers<[1], [0], [0], [1], [0, 0, 1, 1], [], []>} : vector<8x128xbf16>, vector<128x256xbf16>, vector<8x256xf32> -> vector<8x256xf32>
    %c0_9 = arith.constant 0 : index
    %c0_10 = arith.constant 0 : index
    %12 = vector.load %arg5[%c0_9, %c0_10] : memref<1x256xf32, #tpu.memory_space<vmem>>, vector<1x256xf32>
    %13 = vector.broadcast %12 : vector<1x256xf32> to vector<8x256xf32>
    %14 = arith.addf %11, %13 : vector<8x256xf32>
    %cst_11 = arith.constant 0.000000e+00 : f32
    %15 = vector.broadcast %cst_11 : f32 to vector<8x256xf32>
    %16 = arith.maximumf %14, %15 : vector<8x256xf32>
    %17 = arith.truncf %16 : vector<8x256xf32> to vector<8x256xbf16>
    %c0_12 = arith.constant 0 : index
    %c0_13 = arith.constant 0 : index
    %18 = vector.load %arg6[%c0_12, %c0_13] : memref<256x1xbf16, #tpu.memory_space<vmem>>, vector<256x1xbf16>
    %cst_14 = arith.constant dense<0.000000e+00> : vector<8x1xf32>
    %19 = tpu.matmul %17, %18, %cst_14 {dimension_numbers = #tpu.dot_dimension_numbers<[1], [0], [0], [1], [0, 0, 1, 1], [], []>} : vector<8x256xbf16>, vector<256x1xbf16>, vector<8x1xf32> -> vector<8x1xf32>
    %c0_15 = arith.constant 0 : index
    %20 = memref.load %arg7[%c0_15] : memref<1xf32, #tpu.memory_space<smem>>
    %21 = vector.broadcast %20 : f32 to vector<8x1xf32>
    %22 = arith.addf %19, %21 : vector<8x1xf32>
    %c0_16 = arith.constant 0 : index
    %c0_17 = arith.constant 0 : index
    %23 = vector.load %arg8[%c0_16, %c0_17] : memref<8x1xf32, #tpu.memory_space<vmem>>, vector<8x1xf32>
    tpu.vector_store %arg8[%c0_16, %c0_17], %22 {strides = array<i32>} : memref<8x1xf32, #tpu.memory_space<vmem>>, vector<8x1xf32>,
    return
  }
  func.func @transform_0(%arg0: i32) -> (i32, i32) {
    %c0_i32 = arith.constant 0 : i32
    %c0_i32_0 = arith.constant 0 : i32
    return %arg0, %c0_i32 : i32, i32
  }
  func.func @transform_1(%arg0: i32) -> (i32, i32) {
    %c0_i32 = arith.constant 0 : i32
    %c0_i32_0 = arith.constant 0 : i32
    %c0_i32_1 = arith.constant 0 : i32
    return %c0_i32, %c0_i32_0 : i32, i32
  }
  func.func @transform_2(%arg0: i32) -> (i32, i32) {
    %c0_i32 = arith.constant 0 : i32
    %c0_i32_0 = arith.constant 0 : i32
    %c0_i32_1 = arith.constant 0 : i32
    return %c0_i32, %c0_i32_0 : i32, i32
  }
  func.func @transform_3(%arg0: i32) -> (i32, i32) {
    %c0_i32 = arith.constant 0 : i32
    %c0_i32_0 = arith.constant 0 : i32
    %c0_i32_1 = arith.constant 0 : i32
    return %c0_i32, %c0_i32_0 : i32, i32
  }
  func.func @transform_4(%arg0: i32) -> (i32, i32) {
    %c0_i32 = arith.constant 0 : i32
    %c0_i32_0 = arith.constant 0 : i32
    %c0_i32_1 = arith.constant 0 : i32
    return %c0_i32, %c0_i32_0 : i32, i32
  }
  func.func @transform_5(%arg0: i32) -> (i32, i32) {
    %c0_i32 = arith.constant 0 : i32
    %c0_i32_0 = arith.constant 0 : i32
    %c0_i32_1 = arith.constant 0 : i32
    return %c0_i32, %c0_i32_0 : i32, i32
  }
  func.func @transform_6(%arg0: i32) -> i32 {
    %c0_i32 = arith.constant 0 : i32
    %c0_i32_0 = arith.constant 0 : i32
    return %c0_i32 : i32
  }
  func.func @transform_7(%arg0: i32) -> (i32, i32) {
    %c0_i32 = arith.constant 0 : i32
    %c0_i32_0 = arith.constant 0 : i32
    return %arg0, %c0_i32 : i32, i32
  }
}

</mosaic_0001>

<bundles_post_ra>
// kernel: critic_forward.1
= control target key start
LH: loop header
LB: loop body
LE: loop exit
PB: predicated region body
PF: predicated region fallthrough
CT: control target
= control target key end

     0   :  { %v542_v0 = vmov 0.0   ;;  %vm543_vm0 = vmmov 0   ;;  %vm53_vm1 = vcmask 261120   ;;  %v544_v21 = vmov 0   ;;  %s702_s1 = inlined_call_operand.vmem [shape: bf16[32,128], index: 1, kind: input, shape index: {}]   ;;  %s703_s0 = inlined_call_operand.vmem [shape: f32[8,32], index: 0, kind: input, shape index: {}]   ;;  %s704_s3 = inlined_call_operand.vmem [shape: bf16[128,256], index: 3, kind: input, shape index: {}]   ;;  %s705_s5 = inlined_call_operand.vmem [shape: bf16[256,1], index: 5, kind: input, shape index: {}]   ;;  %s706_s2 = inlined_call_operand.vmem [shape: f32[1,128], index: 2, kind: input, shape index: {}]   ;;  %s707_s4 = inlined_call_operand.vmem [shape: f32[1,256], index: 4, kind: input, shape index: {}]   ;;  %s708_s6 = inlined_call_operand.<no memory space> [shape: f32[1], index: 6, kind: input, shape index: {}]   ;;  %s709_s7 = inlined_call_operand.vmem [shape: f32[8,1], index: 7, kind: output, shape index: {}]  }
   0x1   :  { %489 = vmatprep.subr.bf16.mxu0 %v542_v0  ;;  %v500_v1 = vld [vmem:[%s702_s1] sm:$0xff]   ;;  %493 = vmatprep.mubr.msk.bf16.mxu0 %vm543_vm0, %v542_v0  ;;  %v501_v2 = vld [vmem:[%s702_s1 + $0x8] sm:$0xff]   ;;  %v505_v6 = vld [vmem:[%s704_s3 + $0x14] ss:$8 sps:$4 sm:$0xff]   ;;  %v117_v46 = vlaneseq  ;;  %vm422_vm2 = vcmask 7168  }
   0x2   :  { %490 = vmatpush3.bf16.msra.mxu0 %v500_v1  ;;  %v28_v3 = vld [vmem:[%s703_s0] sm:$0xff]  ;;  %v507_v8 = vld [vmem:[%s704_s3 + $0x10] ss:$8 sps:$4 sm:$0xff]   ;;  %v511_v11 = vld [vmem:[%s704_s3 + $0x34] ss:$8 sps:$4 sm:$0xff]   ;;  %239 = vmatprep.mubr.bf16.mxu1 %v544_v21 }
   0x3   :  { %491 = vmatprep.subr.bf16.mxu0 %v542_v0  ;;  %v502_v4 = vld [vmem:[%s704_s3 + $0x4] ss:$8 sps:$4 sm:$0xff]   ;;  %v504_v5 = vld [vmem:[%s704_s3] ss:$8 sps:$4 sm:$0xff]   ;;  %v29_v7 = vpack.c.bf16 %v28_v3, %v28_v3  ;;  %v513_v12 = vld [vmem:[%s704_s3 + $0x30] ss:$8 sps:$4 sm:$0xff]   ;;  %v285_v0 = vstv %s708_s6 }
   0x4   :  { %207 = vmatprep.subr.bf16.mxu1 %v502_v4  ;;  %v508_v9 = vld [vmem:[%s704_s3 + $0x24] ss:$8 sps:$4 sm:$0xff]   ;;  %v510_v10 = vld [vmem:[%s704_s3 + $0x20] ss:$8 sps:$4 sm:$0xff]   ;;  %v517_v15 = vld [vmem:[%s704_s3 + $0x54] ss:$8 sps:$4 sm:$0xff]  }
   0x5   :  { %208 = vmatpush1.bf16.msra.mxu1 %v504_v5  ;;  %v514_v13 = vld [vmem:[%s704_s3 + $0x44] ss:$8 sps:$4 sm:$0xff]   ;;  %v516_v14 = vld [vmem:[%s704_s3 + $0x40] ss:$8 sps:$4 sm:$0xff]   ;;  %v519_v16 = vld [vmem:[%s704_s3 + $0x50] ss:$8 sps:$4 sm:$0xff]  }
   0x6   :  { %492 = vmatpush3.bf16.msra.mxu0 %v501_v2  ;;  %209 = vmatprep.subr.bf16.mxu1 %v505_v6  ;;  %v520_v17 = vld [vmem:[%s704_s3 + $0x64] ss:$8 sps:$4 sm:$0xff]   ;;  %v522_v18 = vld [vmem:[%s704_s3 + $0x60] ss:$8 sps:$4 sm:$0xff]   ;;  %v523_v19 = vld [vmem:[%s704_s3 + $0x74] ss:$8 sps:$4 sm:$0xff]  }
   0x7   :  { %v525_v20 = vld [vmem:[%s704_s3 + $0x70] ss:$8 sps:$4 sm:$0xff]   ;;  %v526_v22 = vld [vmem:[%s705_s5 + $0x40] sm:$0xff]   ;;  %v528_v24 = vld [vmem:[%s705_s5 + $0x48] sm:$0xff]   ;;  %v118_v47 = vshrl.u32 %v117_v46, 7 }
   0x8   :  { %v527_v23 = vld [vmem:[%s705_s5] sm:$0xff]   ;;  %467 = vmatprep.subr.bf16.mxu0 %v526_v22  ;;  %v529_v25 = vld [vmem:[%s705_s5 + $0x8] sm:$0xff]   ;;  %v530_v26 = vld [vmem:[%s705_s5 + $0x50] sm:$0xff]  }
   0x9   :  { %494 = vmatmul.mubr.msk.bf16.vlgmr.msra.gmra.mrb[0].mxu0 %vm53_vm1, %v29_v7  ;;  %210 = vmatpush1.bf16.msra.mxu1 %v507_v8  ;;  %v531_v27 = vld [vmem:[%s705_s5 + $0x10] sm:$0xff]   ;;  %v532_v28 = vld [vmem:[%s705_s5 + $0x58] sm:$0xff]   ;;  %v534_v30 = vld [vmem:[%s705_s5 + $0x60] sm:$0xff]   ;;  %v119_v48 = vsub.s32 0, %v118_v47  ;;  %v123_v50 = vsub.s32 1, %v118_v47 }
   0xa   :  { %211 = vmatprep.subr.bf16.mxu1 %v508_v9  ;;  %468 = vmatpush3.bf16.msra.mxu0 %v527_v23  ;;  %v533_v29 = vld [vmem:[%s705_s5 + $0x18] sm:$0xff]   ;;  %v535_v31 = vld [vmem:[%s705_s5 + $0x20] sm:$0xff]   ;;  %v536_v32 = vld [vmem:[%s705_s5 + $0x68] sm:$0xff]  }
   0xb   :  { %469 = vmatprep.subr.bf16.mxu0 %v528_v24  ;;  %v537_v33 = vld [vmem:[%s705_s5 + $0x28] sm:$0xff]   ;;  %v428_v34 = vld [vmem:[%s706_s2] ss:$0 sm:$0xff]  ;;  %v538_v42 = vld [vmem:[%s705_s5 + $0x70] sm:$0xff]  }
   0xc   :  { %v539_v43 = vld [vmem:[%s705_s5 + $0x30] sm:$0xff]   ;;  %v540_v44 = vld [vmem:[%s705_s5 + $0x78] sm:$0xff]   ;;  %v115_v49 = vld [vmem:[%s707_s4] sm:$0x3] }
   0xd   :  { %212 = vmatpush1.bf16.msra.mxu1 %v510_v10  ;;  %v541_v45 = vld [vmem:[%s705_s5 + $0x38] sm:$0xff]   ;;  %v120_v51 = vrot.slane %v115_v49, %v119_v48  ;;  %v124_v52 = vrot.slane %v115_v49, %v123_v50 }
   0xe   :  { %213 = vmatprep.subr.bf16.mxu1 %v511_v11  ;;  %470 = vmatpush3.bf16.msra.mxu0 %v529_v25 }
   0xf   :  { %471 = vmatprep.subr.bf16.mxu0 %v530_v26 }
  0x11   :  { %214 = vmatpush1.bf16.msra.mxu1 %v513_v12 }
  0x12   :  { %215 = vmatprep.subr.bf16.mxu1 %v514_v13  ;;  %472 = vmatpush3.bf16.msra.mxu0 %v531_v27 }
  0x13   :  { %473 = vmatprep.subr.bf16.mxu0 %v532_v28 }
  0x15   :  { %216 = vmatpush1.bf16.msra.mxu1 %v516_v14 }
  0x16   :  { %217 = vmatprep.subr.bf16.mxu1 %v517_v15  ;;  %474 = vmatpush3.bf16.msra.mxu0 %v533_v29 }
  0x17   :  { %475 = vmatprep.subr.bf16.mxu0 %v534_v30 }
  0x19   :  { %218 = vmatpush1.bf16.msra.mxu1 %v519_v16 }
  0x1a   :  { %219 = vmatprep.subr.bf16.mxu1 %v520_v17  ;;  %476 = vmatpush3.bf16.msra.mxu0 %v535_v31 }
  0x1b   :  { %477 = vmatprep.subr.bf16.mxu0 %v536_v32 }
  0x1d   :  { %220 = vmatpush1.bf16.msra.mxu1 %v522_v18 }
  0x1e   :  { %221 = vmatprep.subr.bf16.mxu1 %v523_v19  ;;  %478 = vmatpush3.bf16.msra.mxu0 %v537_v33 }
  0x1f   :  { %479 = vmatprep.subr.bf16.mxu0 %v538_v42 }
  0x21   :  { %222 = vmatpush1.bf16.msra.mxu1 %v525_v20 }
  0x22   :  { %480 = vmatpush3.bf16.msra.mxu0 %v539_v43 }
  0x23   :  { %481 = vmatprep.subr.bf16.mxu0 %v540_v44 }
  0x26   :  { %482 = vmatpush3.bf16.msra.mxu0 %v541_v45 }
  0xdc   :  { %v91_v35 = vpop.f32.mrb[0].mxu0 }
  0xdd   :  { %v92_v36 = vadd.f32 %v428_v34, %v91_v35  ;;  %v495_v37 = vpop.f32.mrb[1].mxu0 }
  0xde   :  { %v94_v38 = vpop.f32.mrb[2].mxu0 }
  0xdf   :  { %v97_v39 = vmax.f32 %v92_v36, 0.0  ;;  %v496_v40 = vpop.f32.mrb[3].mxu0 }
  0xe1   :  { %v98_v41 = vpack.c.bf16 %v97_v39, %v97_v39 }
  0xe3   :  { %240 = vmatmul.mubr.bf16.vlgmr.msra.gmra.mrb[0].mxu1 %v98_v41 }
 0x1b6   :  { %v241_v53 = vpop.f32.mrb[0].mxu1 }
 0x1b7   :  { %v242_v54 = vadd.f32 %v241_v53, %v120_v51  ;;  %v243_v55 = vpop.f32.mrb[1].mxu1 }
 0x1b8   :  { %v244_v56 = vadd.f32 %v243_v55, %v124_v52  ;;  %v245_v57 = vpop.f32.mrb[2].mxu1 }
 0x1b9   :  { %v248_v58 = vmax.f32 %v242_v54, 0.0  ;;  %v246_v59 = vpop.f32.mrb[3].mxu1 }
 0x1ba   :  { %v249_v60 = vmax.f32 %v244_v56, 0.0 }
 0x1bb   :  { %v250_v62 = vpack.c.bf16 %v248_v58, %v248_v58 }
 0x1bc   :  { %v251_v61 = vpack.c.bf16 %v249_v60, %v249_v60 }
 0x1be   :  { %414 = vmatprep.mubr.bf16.mxu0 %v251_v61 }
 0x1bf   :  { %415 = vmatmul.mubr.bf16.vlgmr.msra.gmra.mrb[4].mxu0 %v250_v62 }
 0x292   :  { %v483_v63 = vpop.f32.mrb[4].mxu0 }
 0x293   :  { %v484_v1 = vpop.f32.mrb[5].mxu0 }
 0x294   :  { %v485_v2 = vadd.f32 %v484_v1, %v483_v63  ;;  %v486_v3 = vpop.f32.mrb[6].mxu0 }
 0x295   :  { %v487_v4 = vpop.f32.mrb[7].mxu0 }
 0x296   :  { %v417_v5 = vadd.f32 %v485_v2, %v285_v0 }
 0x298   :  { %423 = vst.msk [vmem:[%s709_s7] sm:$0xff] %vm422_vm2, %v417_v5 }

</bundles_post_ra>
